<compile_context>
chip_gen: v7x
topology: tpu7x:2x2x1
jax: 0.10.0
libtpu: 0.0.40
codegen_flags: <defaults>
</compile_context>

<pallas_src>
import jax
import jax.numpy as jnp
from jax.experimental import pallas as pl
from jax.experimental.pallas import tpu as pltpu

HDIMS = 10
HLAYERS = 0
IN_DIMS = 4        # flip=False
OUT_DIMS = 10

# Samples packed per vreg row (limited by OUT: 12 * 10 = 120 <= 128 lanes).
PACK = 12
IN_LANES = PACK * IN_DIMS      # 48
HID_LANES = PACK * HDIMS       # 120
OUT_LANES = PACK * OUT_DIMS    # 120
assert IN_LANES <= 128 and HID_LANES <= 128 and OUT_LANES <= 128


def _round_up(n, m):
    return (n + m - 1) // m * m


# ---------------------------------------------------------------------------
# Packed-parameter slab layout: rows of a (SLAB_ROWS, 128) f32 array.
# Every block starts on an 8-sublane boundary.
# ---------------------------------------------------------------------------
_W1_OFF = 0
_W1_ROWS = _round_up(IN_LANES, 8)            # 48
_B1_OFF = _W1_OFF + _W1_ROWS                 # 48  (row 48 used, 8-row chunk)
if HLAYERS > 0:
    _W2_OFF = _B1_OFF + 8
    _B2_OFF = _W2_OFF + 128
    _W3_OFF = _B2_OFF + 8
else:
    _W2_OFF = _B1_OFF + 8                    # unused
    _B2_OFF = _W2_OFF                        # unused
    _W3_OFF = _B1_OFF + 8                    # 56
_B3_OFF = _W3_OFF + 128                      # 184
_SLAB_ROWS = _round_up(_B3_OFF + 1, 8)       # 192
_SLAB_COLS = 128


def _mlp_kernel(x_ref, p_ref, o_ref):
    x = x_ref[...]                                     # (TM, IN_LANES) lane-dense

    # fc1 + relu, on 12 packed samples per row (block-diagonal weights).
    w1 = p_ref[_W1_OFF:_W1_OFF + IN_LANES, :]          # (48, 128)
    b1 = p_ref[_B1_OFF:_B1_OFF + 1, :]                 # (1, 128); lanes >=120 are 0
    h = jnp.dot(x, w1, preferred_element_type=jnp.float32) + b1
    h = jnp.maximum(h, 0.0)                            # (TM, 128); pad lanes stay 0

    # nn.Dropout(p=0.5): identity at inference / eval time.
    # TODO(synk): training-mode dropout (pltpu.prng_seed + prng_random_bits
    #             mask with 1/(1-p) scaling) not emitted.

    for _ in range(HLAYERS):                           # HLAYERS == 0 -> unrolls away
        w2 = p_ref[_W2_OFF:_W2_OFF + 128, :]
        b2 = p_ref[_B2_OFF:_B2_OFF + 1, :]
        h = jnp.maximum(
            jnp.dot(h, w2, preferred_element_type=jnp.float32) + b2, 0.0)

    # fc3 (no activation)
    w3 = p_ref[_W3_OFF:_W3_OFF + 128, :]               # (128, 128)
    b3 = p_ref[_B3_OFF:_B3_OFF + 1, :]                 # (1, 128)
    out = jnp.dot(h, w3, preferred_element_type=jnp.float32) + b3
    o_ref[...] = out[:, :OUT_LANES].astype(o_ref.dtype)


def net_forward(x, slab, *, tm_max=4096):
    """x: (batch, IN_DIMS) f32.  slab: packed (_SLAB_ROWS, 128) f32 params."""
    batch = x.shape[0]
    rows = pl.cdiv(batch, PACK)                        # packed rows needed

    # Tile selection: multiple of 8 sublanes; for medium batches aim for
    # >= 2 grid steps so v7x's 2 TensorCores both get work; cap at tm_max so
    # the double-buffered footprint (~2 KiB/row packed) stays well under
    # v7x's 64 MiB VMEM.
    if rows <= 8:
        tm = 8
    else:
        tm = min(tm_max, _round_up(pl.cdiv(rows, 2), 8))
    grid_m = pl.cdiv(rows, tm)
    rows_p = grid_m * tm
    samples_p = rows_p * PACK

    if samples_p != batch:
        # Zero rows: their outputs are nonzero (biases), sliced off below.
        x = jnp.pad(x, ((0, samples_p - batch), (0, 0)))
    xp = x.reshape(rows_p, IN_LANES)                   # pure row-major reshape

    flops = 2 * samples_p * (IN_DIMS * HDIMS
                             + HLAYERS * HDIMS * HDIMS
                             + HDIMS * OUT_DIMS)
    bytes_accessed = (rows_p * (IN_LANES + OUT_LANES) * 4
                      + _SLAB_ROWS * _SLAB_COLS * 4)

    out = pl.pallas_call(
        _mlp_kernel,
        out_shape=jax.ShapeDtypeStruct((rows_p, OUT_LANES), jnp.float32),
        grid=(grid_m,),
        in_specs=[
            pl.BlockSpec((tm, IN_LANES), lambda i: (i, 0)),
            # Packed param slab: single block, constant index_map -> one DMA,
            # VMEM-resident across all grid steps.
            pl.BlockSpec((_SLAB_ROWS, _SLAB_COLS), lambda i: (0, 0)),
        ],
        out_specs=pl.BlockSpec((tm, OUT_LANES), lambda i: (i, 0)),
        compiler_params=pltpu.CompilerParams(
            dimension_semantics=("parallel",),          # shard batch over TCs (v7x)
            vmem_limit_bytes=32 * 1024 * 1024,
        ),
        cost_estimate=pl.CostEstimate(
            flops=int(flops), transcendentals=0,
            bytes_accessed=int(bytes_accessed)),
    )(xp, slab)

    out = out.reshape(samples_p, OUT_DIMS)             # free reshape back
    return out[:batch] if samples_p != batch else out


def init_params(key):
    """Deterministic param init matching nn.Linear shapes (stored transposed)."""
    ks = jax.random.split(key, 6)

    def lin(kw, kb, fan_in, fan_out):
        bound = 1.0 / jnp.sqrt(fan_in)
        w = jax.random.uniform(kw, (fan_in, fan_out), jnp.float32, -bound, bound)
        b = jax.random.uniform(kb, (1, fan_out), jnp.float32, -bound, bound)
        return w, b

    w1, b1 = lin(ks[0], ks[1], IN_DIMS, HDIMS)
    w2, b2 = lin(ks[2], ks[3], HDIMS, HDIMS)    # exists in the module, unused (hlayers=0)
    w3, b3 = lin(ks[4], ks[5], HDIMS, OUT_DIMS)
    return {"w1": w1, "b1": b1, "w2": w2, "b2": b2, "w3": w3, "b3": b3}


def pack_params(params):
    """Host-side (once): build block-diagonal, lane-aligned (192,128) f32 slab."""
    slab = jnp.zeros((_SLAB_ROWS, _SLAB_COLS), jnp.float32)
    w1 = params["w1"]
    b1 = params["b1"].reshape(-1)
    w3 = params["w3"]
    b3 = params["b3"].reshape(-1)
    for k in range(PACK):
        slab = slab.at[_W1_OFF + IN_DIMS * k:_W1_OFF + IN_DIMS * (k + 1),
                       HDIMS * k:HDIMS * (k + 1)].set(w1)
        slab = slab.at[_B1_OFF, HDIMS * k:HDIMS * (k + 1)].set(b1)
        if HLAYERS > 0:
            slab = slab.at[_W2_OFF + HDIMS * k:_W2_OFF + HDIMS * (k + 1),
                           HDIMS * k:HDIMS * (k + 1)].set(params["w2"])
            slab = slab.at[_B2_OFF, HDIMS * k:HDIMS * (k + 1)].set(
                params["b2"].reshape(-1))
        slab = slab.at[_W3_OFF + HDIMS * k:_W3_OFF + HDIMS * (k + 1),
                       OUT_DIMS * k:OUT_DIMS * (k + 1)].set(w3)
        slab = slab.at[_B3_OFF, OUT_DIMS * k:OUT_DIMS * (k + 1)].set(b3)
    return slab


def net_forward_ref(x, params):
    h = jnp.maximum(x @ params["w1"] + params["b1"], 0.0)
    for _ in range(HLAYERS):
        h = jnp.maximum(h @ params["w2"] + params["b2"], 0.0)
    return h @ params["w3"] + params["b3"]


if __name__ == "__main__":
    key = jax.random.PRNGKey(0)
    kx, kp = jax.random.split(key)
    params = init_params(kp)
    slab = pack_params(params)

    # Small deterministic input consistent with the module: (batch=8, in_dims=4).
    batch = 8
    x = jax.random.normal(kx, (batch, IN_DIMS), jnp.float32)
    out = net_forward(x, slab)
    jax.block_until_ready(out)
    ref = net_forward_ref(x, params)
    assert out.shape == (batch, OUT_DIMS)
    assert jnp.allclose(out, ref, atol=1e-5, rtol=1e-5)

    # Exercise the tiled / padded path: batch not a multiple of PACK, grid >= 2.
    x2 = jax.random.normal(kx, (200, IN_DIMS), jnp.float32)
    out2 = net_forward(x2, slab)
    jax.block_until_ready(out2)
    assert out2.shape == (200, OUT_DIMS)
    assert jnp.allclose(out2, net_forward_ref(x2, params), atol=1e-5, rtol=1e-5)

    print("KERNEL_OK")
</pallas_src>

<mosaic_0001>
module attributes {stable_mosaic.version = 11 : i64} {
  func.func @_mlp_kernel(%arg0: i32, %arg1: memref<8x48xf32, #tpu.memory_space<vmem>>, %arg2: memref<192x128xf32, #tpu.memory_space<vmem>>, %arg3: memref<8x120xf32, #tpu.memory_space<vmem>>) attributes {dimension_semantics = [#tpu.dimension_semantics<parallel>], iteration_bounds = array<i64: 1>, scalar_prefetch = 0 : i64, scratch_operands = 0 : i64, tpu.core_type = #tpu.core_type<tc>, window_params = [{transform_indices = @transform_0, window_bounds = array<i64: 8, 48>}, {pipeline_mode = #tpu.pipeline_mode<synchronous>, transform_indices = @transform_1, window_bounds = array<i64: 192, 128>}, {transform_indices = @transform_2, window_bounds = array<i64: 8, 120>}]} {
    %c0 = arith.constant 0 : index
    %c0_0 = arith.constant 0 : index
    %0 = vector.load %arg1[%c0, %c0_0] : memref<8x48xf32, #tpu.memory_space<vmem>>, vector<8x48xf32>
    %c0_1 = arith.constant 0 : index
    %c0_2 = arith.constant 0 : index
    %1 = vector.load %arg2[%c0_1, %c0_2] : memref<192x128xf32, #tpu.memory_space<vmem>>, vector<48x128xf32>
    %c48 = arith.constant 48 : index
    %c0_3 = arith.constant 0 : index
    %2 = vector.load %arg2[%c48, %c0_3] : memref<192x128xf32, #tpu.memory_space<vmem>>, vector<1x128xf32>
    %cst = arith.constant dense<0.000000e+00> : vector<8x128xf32>
    %3 = tpu.matmul %0, %1, %cst {dimension_numbers = #tpu.dot_dimension_numbers<[1], [0], [0], [1], [0, 0, 1, 1], [], []>} : vector<8x48xf32>, vector<48x128xf32>, vector<8x128xf32> -> vector<8x128xf32>
    %4 = vector.broadcast %2 : vector<1x128xf32> to vector<8x128xf32>
    %5 = arith.addf %3, %4 : vector<8x128xf32>
    %cst_4 = arith.constant 0.000000e+00 : f32
    %6 = vector.broadcast %cst_4 : f32 to vector<8x128xf32>
    %7 = arith.maximumf %5, %6 : vector<8x128xf32>
    %c56 = arith.constant 56 : index
    %c0_5 = arith.constant 0 : index
    %8 = vector.load %arg2[%c56, %c0_5] : memref<192x128xf32, #tpu.memory_space<vmem>>, vector<128x128xf32>
    %c184 = arith.constant 184 : index
    %c0_6 = arith.constant 0 : index
    %9 = vector.load %arg2[%c184, %c0_6] : memref<192x128xf32, #tpu.memory_space<vmem>>, vector<1x128xf32>
    %cst_7 = arith.constant dense<0.000000e+00> : vector<8x128xf32>
    %10 = tpu.matmul %7, %8, %cst_7 {dimension_numbers = #tpu.dot_dimension_numbers<[1], [0], [0], [1], [0, 0, 1, 1], [], []>} : vector<8x128xf32>, vector<128x128xf32>, vector<8x128xf32> -> vector<8x128xf32>
    %11 = vector.broadcast %9 : vector<1x128xf32> to vector<8x128xf32>
    %12 = arith.addf %10, %11 : vector<8x128xf32>
    %13 = vector.extract_strided_slice %12 {offsets = [0, 0], sizes = [8, 120], strides = [1, 1]} : vector<8x128xf32> to vector<8x120xf32>
    %c0_8 = arith.constant 0 : index
    %c0_9 = arith.constant 0 : index
    %14 = vector.load %arg3[%c0_8, %c0_9] : memref<8x120xf32, #tpu.memory_space<vmem>>, vector<8x120xf32>
    tpu.vector_store %arg3[%c0_8, %c0_9], %13 {strides = array<i32>} : memref<8x120xf32, #tpu.memory_space<vmem>>, vector<8x120xf32>,
    return
  }
  func.func @transform_0(%arg0: i32) -> (i32, i32) {
    %c0_i32 = arith.constant 0 : i32
    %c0_i32_0 = arith.constant 0 : i32
    return %arg0, %c0_i32 : i32, i32
  }
  func.func @transform_1(%arg0: i32) -> (i32, i32) {
    %c0_i32 = arith.constant 0 : i32
    %c0_i32_0 = arith.constant 0 : i32
    %c0_i32_1 = arith.constant 0 : i32
    return %c0_i32, %c0_i32_0 : i32, i32
  }
  func.func @transform_2(%arg0: i32) -> (i32, i32) {
    %c0_i32 = arith.constant 0 : i32
    %c0_i32_0 = arith.constant 0 : i32
    return %arg0, %c0_i32 : i32, i32
  }
}

</mosaic_0001>

<bundles_post_ra>
// kernel: tpu_custom_call.1
= control target key start
LH: loop header
LB: loop body
LE: loop exit
PB: predicated region body
PF: predicated region fallthrough
CT: control target
= control target key end

     0   :  { %7 = vsyncpa [#allocation3], 0  ;;  %s490_s0 = inlined_call_operand.hbm [shape: f32[8,48], index: 0, kind: input, shape index: {}]   ;;  %s491_s1 = inlined_call_operand.hbm [shape: f32[192,128], index: 1, kind: input, shape index: {}]   ;;  %s492_s2 = inlined_call_operand.hbm [shape: f32[8,120], index: 2, kind: output, shape index: {}]  }
   0x1   :  { %8 = vsyncpa [#allocation6], 0 }
   0x2   :  { %9 = vsyncpa [#allocation4], 0  ;;  %s424_s9 = smov [#allocation2]   ;;  %s425_s11 = smov [#allocation5]  }
   0x3   :  { %s16_s10 = sshll.u32 %s424_s9, 4  ;;  %s25_s12 = sshll.u32 %s425_s11, 4  ;;  %s17_s10 = int_to_ptr.vmem [resolvable:$true] %s16_s10  ;;  %s447_s12 = int_to_ptr.vmem [resolvable:$true] %s25_s12 }
   0x4   :  { %s352_s15 = scalar_lea.hbm %s490_s0, 128 }
   0x5   :  { %p353_p0 = scmp.ne.s32.totalorder %s490_s0, %s352_s15  ;;  %p356_p1 = scmp.lt.u32.totalorder %s352_s15, %s490_s0 }
   0x7   :  { %p358_p2 = pnand %p356_p1, %p353_p0 }
   0x9   :  { %361 = shalt.err (!%p358_p2)
}
   0xa   :  { %s362_s20 = scalar_lea.vmem %s17_s10, 128  ;;  %p367_p4 = scmp.lt.s32.totalorder %s17_s10, %s17_s10 }
   0xb   :  { %p363_p3 = scmp.ne.s32.totalorder %s17_s10, %s362_s20  ;;  %p368_p5 = scmp.lt.s32.totalorder %s362_s20, %s362_s20 }
   0xd   :  { %p369_p6 = por %p368_p5, %p367_p4 }
   0xf   :  { %p370_p7 = pnand %p369_p6, %p363_p3 }
  0x11   :  { %373 = shalt.err (!%p370_p7)
}
  0x12   :  { %19 = dma.hbm_to_vmem [thread:$0]  %s490_s0, 128, %s17_s10, [#allocation3]  }
  0x13   :  { %s374_s25 = scalar_lea.hbm %s491_s1, 3072 }
  0x14   :  { %p375_p8 = scmp.ne.s32.totalorder %s491_s1, %s374_s25  ;;  %p378_p9 = scmp.lt.u32.totalorder %s374_s25, %s491_s1 }
  0x16   :  { %p380_p10 = pnand %p378_p9, %p375_p8 }
  0x18   :  { %383 = shalt.err (!%p380_p10)
}
  0x19   :  { %s384_s30 = scalar_lea.vmem %s447_s12, 3072  ;;  %p389_p12 = scmp.lt.s32.totalorder %s447_s12, %s447_s12 }
  0x1a   :  { %p385_p11 = scmp.ne.s32.totalorder %s447_s12, %s384_s30  ;;  %p390_p13 = scmp.lt.s32.totalorder %s384_s30, %s384_s30 }
  0x1c   :  { %p391_p0 = por %p390_p13, %p389_p12 }
  0x1e   :  { %p392_p1 = pnand %p391_p0, %p385_p11 }
  0x20   :  { %395 = shalt.err (!%p392_p1)
}
  0x21   :  { %s426_s0 = smov 128   ;;  %s427_s3 = smov 8  }
  0x22   :  { %31 = dma.hbm_to_vmem [thread:$0]  %s491_s1, 3072, %s447_s12, [#allocation6], %s426_s0, %s426_s0, %s427_s3  }
  0x23   :  { %418 = dma.done.wait [#allocation3], 128  }
  0x24   :  { %419 = vsyncadd [#allocation3], 4294967168 }
  0x25   :  { %420 = dma.done.wait [#allocation6], 3072  }
  0x26   :  { %421 = vsyncadd [#allocation6], 4294964224  ;;  %v428_v0 = vmov 0.0|0.0   ;;  %vm429_vm0 = vmmov 0   ;;  %v430_v1 = vmov 0.0   ;;  %v39_v2 = vld [vmem:[#allocation5] sm:$0xff] }
  0x27   :  { %311 = vmatprep.subr.bf16.mxu0 %v428_v0  ;;  %273 = vmatprep.mubr.msk.f32.mxu0 %vm429_vm0, %v430_v1  ;;  %v40_v3 = vld [vmem:[#allocation5 + $0x8] sm:$0xff]  ;;  %v41_v4 = vld [vmem:[#allocation5 + $0x10] sm:$0xff]  ;;  %v42_v6 = vld [vmem:[#allocation5 + $0x18] sm:$0xff]  ;;  %vm50_vm1 = vcmask 392192   ;;  %s431_s1 = smov [#allocation7]   ;;  %vm216_vm2 = vcmask 982016  }
  0x28   :  { %320 = vmatprep.subr.bf16.mxu1 %v428_v0  ;;  %308 = vmatprep.mubr.msk.f32.mxu1 %vm429_vm0, %v430_v1  ;;  %v312_v5 = vpack.c.bf16 %v40_v3, %v39_v2  ;;  %v125_v7 = vld [vmem:[#allocation5 + $0x38] sm:$0xff]  ;;  %v126_v8 = vld [vmem:[#allocation5 + $0x40] sm:$0xff]  ;;  %v315_v9 = vpack.c.bf16 %v42_v6, %v41_v4  ;;  %v127_v11 = vld [vmem:[#allocation5 + $0x48] sm:$0xff]  ;;  %s224_s6 = sshll.u32 %s431_s1, 4  ;;  %s225_s6 = int_to_ptr.vmem [resolvable:$true] %s224_s6 }
  0x29   :  { %v321_v10 = vpack.c.bf16 %v126_v8, %v125_v7  ;;  %v128_v12 = vld [vmem:[#allocation5 + $0x50] sm:$0xff]  ;;  %v43_v13 = vld [vmem:[#allocation5 + $0x20] sm:$0xff]  ;;  %v44_v14 = vld [vmem:[#allocation5 + $0x28] sm:$0xff]  ;;  %s396_s7 = scalar_lea.vmem %s225_s6, 128  ;;  %p401_p3 = scmp.lt.s32.totalorder %s225_s6, %s225_s6 }
  0x2a   :  { %313 = vmatpush3.bf16.msra.mxu0 %v312_v5  ;;  %v324_v15 = vpack.c.bf16 %v128_v12, %v127_v11  ;;  %v129_v16 = vld [vmem:[#allocation5 + $0x58] sm:$0xff]  ;;  %v130_v17 = vld [vmem:[#allocation5 + $0x60] sm:$0xff]  ;;  %v318_v18 = vpack.c.bf16 %v44_v14, %v43_v13  ;;  %v131_v20 = vld [vmem:[#allocation5 + $0x68] sm:$0xff]  ;;  %p397_p2 = scmp.ne.s32.totalorder %s225_s6, %s396_s7  ;;  %p402_p4 = scmp.lt.s32.totalorder %s396_s7, %s396_s7 }
  0x2b   :  { %314 = vmatprep.subr.bf16.mxu0 %v428_v0  ;;  %322 = vmatpush3.bf16.msra.mxu1 %v321_v10  ;;  %v327_v19 = vpack.c.bf16 %v130_v17, %v129_v16  ;;  %v132_v21 = vld [vmem:[#allocation5 + $0x70] sm:$0xff]  ;;  %v38_v22 = vld [vmem:[#allocation2] sm:$0xff]  ;;  %v134_v25 = vld [vmem:[#allocation5 + $0x80] sm:$0xff] }
  0x2c   :  { %323 = vmatprep.subr.bf16.mxu1 %v428_v0  ;;  %v330_v23 = vpack.c.bf16 %v132_v21, %v131_v20  ;;  %v133_v24 = vld [vmem:[#allocation5 + $0x78] sm:$0xff]  ;;  %v135_v27 = vld [vmem:[#allocation5 + $0x88] sm:$0xff]  ;;  %v136_v28 = vld [vmem:[#allocation5 + $0x90] sm:$0xff]  ;;  %p403_p5 = por %p402_p4, %p401_p3 }
  0x2d   :  { %v333_v26 = vpack.c.bf16 %v134_v25, %v133_v24  ;;  %v336_v29 = vpack.c.bf16 %v136_v28, %v135_v27  ;;  %v137_v30 = vld [vmem:[#allocation5 + $0x98] sm:$0xff]  ;;  %v138_v31 = vld [vmem:[#allocation5 + $0xa0] sm:$0xff]  ;;  %v139_v33 = vld [vmem:[#allocation5 + $0xa8] sm:$0xff] }
  0x2e   :  { %316 = vmatpush3.bf16.msra.mxu0 %v315_v9  ;;  %v339_v32 = vpack.c.bf16 %v138_v31, %v137_v30  ;;  %v140_v34 = vld [vmem:[#allocation5 + $0xb0] sm:$0xff]  ;;  %v236_v41 = vld [vmem:[#allocation5 + $0xb8] ss:$0 sm:$0xff]  ;;  %p404_p6 = pnand %p403_p5, %p397_p2 }
  0x2f   :  { %317 = vmatprep.subr.bf16.mxu0 %v428_v0  ;;  %325 = vmatpush3.bf16.msra.mxu1 %v324_v15  ;;  %v342_v35 = vpack.c.bf16 %v140_v34, %v139_v33  ;;  %v234_v36 = vld [vmem:[#allocation5 + $0x30] ss:$0 sm:$0xff] }
  0x30   :  { %326 = vmatprep.subr.bf16.mxu1 %v428_v0 }
  0x32   :  { %319 = vmatpush3.bf16.msra.mxu0 %v318_v18 }
  0x33   :  { %328 = vmatpush3.bf16.msra.mxu1 %v327_v19 }
  0x34   :  { %329 = vmatprep.subr.bf16.mxu1 %v428_v0 }
  0x35   :  { %274 = vmatmul.mubr.msk.f32.vlgmr.msra.gmra.mrb[0].mxu0 %vm50_vm1, %v38_v22 }
  0x37   :  { %331 = vmatpush3.bf16.msra.mxu1 %v330_v23 }
  0x38   :  { %332 = vmatprep.subr.bf16.mxu1 %v428_v0 }
  0x3b   :  { %334 = vmatpush3.bf16.msra.mxu1 %v333_v26 }
  0x3c   :  { %335 = vmatprep.subr.bf16.mxu1 %v428_v0 }
  0x3f   :  { %337 = vmatpush3.bf16.msra.mxu1 %v336_v29 }
  0x40   :  { %338 = vmatprep.subr.bf16.mxu1 %v428_v0 }
  0x43   :  { %340 = vmatpush3.bf16.msra.mxu1 %v339_v32 }
  0x44   :  { %341 = vmatprep.subr.bf16.mxu1 %v428_v0 }
  0x47   :  { %343 = vmatpush3.bf16.msra.mxu1 %v342_v35 }
 0x108   :  { %v120_v37 = vpop.f32.mrb[0].mxu0 }
 0x109   :  { %v121_v38 = vadd.f32 %v234_v36, %v120_v37  ;;  %v275_v39 = vpop.f32.mrb[1].mxu0 }
 0x10b   :  { %v124_v40 = vmax.f32 %v121_v38, 0.0 }
 0x10d   :  { %309 = vmatmul.mubr.f32.vlgmr.msra.gmra.mrb[0].mxu1 %v124_v40 }
 0x1e0   :  { %v212_v42 = vpop.f32.mrb[0].mxu1 }
 0x1e1   :  { %v213_v43 = vadd.f32 %v236_v41, %v212_v42  ;;  %v310_v44 = vpop.f32.mrb[1].mxu1 }
 0x1e3   :  { %217 = vst.msk [vmem:[#allocation7] sm:$0xff] %vm216_vm2, %v213_v43 }
 0x1e4   :  { %407 = shalt.err (!%p404_p6)
}
 0x1e5   :  { %s408_s10 = scalar_lea.hbm %s492_s2, 128 }
 0x1e6   :  { %p409_p7 = scmp.ne.s32.totalorder %s492_s2, %s408_s10  ;;  %p412_p8 = scmp.lt.u32.totalorder %s408_s10, %s492_s2 }
 0x1e8   :  { %p414_p9 = pnand %p412_p8, %p409_p7 }
 0x1ea   :  { %417 = shalt.err (!%p414_p9)
}
 0x1eb   :  { %227 = dma.vmem_to_hbm [thread:$0]  %s225_s6, 128, %s492_s2, [#allocation4]  }
 0x1ec   :  { %422 = dma.done.wait [#allocation4], 128  }
 0x1ed   :  { %423 = vsyncadd [#allocation4], 4294967168 }
 0x1ee   :  { %231 = vsyncpa [#allocation3], 1 }
 0x1ef   :  { %232 = vsyncpa [#allocation6], 1 }
 0x1f0   :  { %233 = vsyncpa [#allocation4], 1 }

</bundles_post_ra>
